<compile_context>
chip_gen: v6e
topology: v6e:2x2x1
jax: 0.10.0
libtpu: 0.0.40
codegen_flags: <defaults>
</compile_context>

<pallas_src>
import functools
import math

import jax
import jax.numpy as jnp
from jax import lax
from jax.experimental import pallas as pl
from jax.experimental.pallas import tpu as pltpu


def _round_up(x: int, m: int) -> int:
    return ((x + m - 1) // m) * m


def _vmem_cap_bytes() -> int:
    """Usable scoped-VMEM cap for the resident-LUT path (generation aware)."""
    cap = None
    try:
        cap = int(pltpu.get_tpu_info().vmem_capacity_bytes)
    except Exception:
        cap = None
    if not cap:
        try:
            kind = jax.devices()[0].device_kind.lower()
        except Exception:
            kind = ""
        if any(t in kind for t in ("v4", "v5", "v6")):
            cap = 128 * 1024 * 1024          # v4/v5e/v5p/v6e: 128 MiB VMEM
        else:
            cap = 64 * 1024 * 1024           # v7x / unknown: 64 MiB per TC
    # Leave headroom for Mosaic internal scratch and pipeline buffers:
    # ~100 MiB usable on 128-MiB parts, ~48 MiB on 64-MiB parts.
    return min(cap - (16 << 20), (cap * 4) // 5)


def _embed_onehot_kernel(ids_ref, lut_ref, out_ref, *, scale):
    """One-hot MXU gather.  ids_ref: (t, 1) i32 VMEM; lut_ref: (V, D) VMEM
    (resident); out_ref: (t, D).  Scale fused into the single store."""
    t_tile = ids_ref.shape[0]
    n_token = lut_ref.shape[0]
    iota = lax.broadcasted_iota(jnp.int32, (t_tile, n_token), 1)
    one_hot = (ids_ref[...] == iota).astype(lut_ref.dtype)        # (t, V)
    acc = jnp.dot(one_hot, lut_ref[...],
                  preferred_element_type=jnp.float32)             # (t, D) f32
    out_ref[...] = (acc * scale).astype(out_ref.dtype)            # fused scale


def _embed_gather_kernel(ids_ref, lut_ref, out_ref, *, scale):
    """Large-vocab fallback: exact row gather from the resident LUT, 8 rows
    per (full-sublane) store, scale fused.  ids_ref: (1, t) i32 in SMEM."""
    t_tile = out_ref.shape[0]

    def body(blk, carry):
        off = pl.multiple_of(blk * 8, 8)
        rows = [lut_ref[pl.ds(ids_ref[0, off + r], 1), :] for r in range(8)]
        chunk = jnp.concatenate(rows, axis=0).astype(jnp.float32)  # (8, D)
        out_ref[pl.ds(off, 8), :] = (chunk * scale).astype(out_ref.dtype)
        return carry

    lax.fori_loop(0, t_tile // 8, body, 0)


def embeddings_forward(x_ids, lut, *, tile_tokens: int = 512,
                       onehot_max_vocab: int = 4096):
    """lut[x_ids] * sqrt(d_model).

    x_ids: int array (...,) of token ids; lut: (n_token, d_model) float table.
    Returns shape x_ids.shape + (d_model,).  For best store efficiency d_model
    should be a multiple of 128 (smaller is still correct).  For very long
    sequences, tile_tokens=1024 amortizes per-step overhead even further.
    """
    assert tile_tokens % 8 == 0, "tile_tokens must be a multiple of 8"
    n_token, d_model = lut.shape
    orig_shape = x_ids.shape

    flat_ids = x_ids.reshape(-1).astype(jnp.int32)
    # Clamp so a bad id can never index out of bounds inside the kernel.
    flat_ids = jnp.clip(flat_ids, 0, n_token - 1)
    n = flat_ids.shape[0]

    t_tile = max(8, min(tile_tokens, _round_up(n, 8)))
    n_tiles = pl.cdiv(n, t_tile)
    n_pad = n_tiles * t_tile
    if n_pad != n:
        flat_ids = jnp.concatenate(
            [flat_ids, jnp.zeros((n_pad - n,), jnp.int32)])

    scale = math.sqrt(float(d_model))
    itemsize = jnp.dtype(lut.dtype).itemsize
    use_onehot = n_token <= onehot_max_vocab

    # VMEM budget: resident table (2x for pipeline buffers), double-buffered
    # output tiles & id tiles, one-hot intermediate, plus slack.  No 32-MiB
    # floor -- tiny tables reserve only what they need.
    lut_bytes = n_token * d_model * itemsize
    out_tile_bytes = t_tile * d_model * itemsize
    onehot_bytes = t_tile * n_token * itemsize if use_onehot else 0
    needed = (2 * lut_bytes + 2 * out_tile_bytes + 2 * t_tile * 4
              + onehot_bytes + (4 << 20))
    vmem_limit = int(min(_vmem_cap_bytes(), needed))

    compiler_params = pltpu.CompilerParams(
        dimension_semantics=("parallel",),      # independent token tiles
        vmem_limit_bytes=vmem_limit,
    )
    out_shape = jax.ShapeDtypeStruct((n_pad, d_model), lut.dtype)
    lut_spec = pl.BlockSpec((n_token, d_model), lambda i: (0, 0))  # resident
    out_spec = pl.BlockSpec((t_tile, d_model), lambda i: (i, 0))

    if use_onehot:
        ids2d = flat_ids.reshape(n_pad, 1)
        out_flat = pl.pallas_call(
            functools.partial(_embed_onehot_kernel, scale=scale),
            out_shape=out_shape,
            grid=(n_tiles,),
            in_specs=[
                pl.BlockSpec((t_tile, 1), lambda i: (i, 0)),       # ids, VMEM
                lut_spec,
            ],
            out_specs=out_spec,
            compiler_params=compiler_params,
        )(ids2d, lut)
    else:
        ids2d = flat_ids.reshape(n_tiles, t_tile)
        out_flat = pl.pallas_call(
            functools.partial(_embed_gather_kernel, scale=scale),
            out_shape=out_shape,
            grid=(n_tiles,),
            in_specs=[
                pl.BlockSpec((1, t_tile), lambda i: (i, 0),
                             memory_space=pltpu.MemorySpace.SMEM),  # ids, SMEM
                lut_spec,
            ],
            out_specs=out_spec,
            compiler_params=compiler_params,
        )(ids2d, lut)

    if n_pad != n:
        out_flat = out_flat[:n]
    return out_flat.reshape(orig_shape + (d_model,))


if __name__ == "__main__":
    # Small synthetic shapes consistent with the module (d_model a multiple of
    # 128 so the output tile is lane-dense).
    n_token, d_model = 64, 128
    B, S = 2, 8

    key = jax.random.PRNGKey(0)
    k_lut, k_ids = jax.random.split(key)

    # nn.Embedding default init is N(0, 1).
    lut = jax.random.normal(k_lut, (n_token, d_model), dtype=jnp.float32)
    x_ids = jax.random.randint(k_ids, (B, S), 0, n_token, dtype=jnp.int32)

    out = jax.block_until_ready(embeddings_forward(x_ids, lut))
    ref = jnp.take(lut, x_ids, axis=0) * math.sqrt(float(d_model))
    assert out.shape == (B, S, d_model), out.shape
    assert jnp.allclose(out, ref, atol=1e-4, rtol=1e-5), "mismatch vs reference"

    # Second check: ragged token count (exercises padding + multi-tile grid).
    x2 = jax.random.randint(jax.random.PRNGKey(1), (3, 5), 0, n_token,
                            dtype=jnp.int32)
    out2 = jax.block_until_ready(embeddings_forward(x2, lut, tile_tokens=8))
    ref2 = jnp.take(lut, x2, axis=0) * math.sqrt(float(d_model))
    assert out2.shape == (3, 5, d_model), out2.shape
    assert jnp.allclose(out2, ref2, atol=1e-4, rtol=1e-5), "ragged mismatch"

    print("KERNEL_OK")
</pallas_src>

<mosaic_0001>
module attributes {stable_mosaic.version = 11 : i64} {
  func.func @_embed_onehot_kernel(%arg0: i32, %arg1: memref<16x1xi32, #tpu.memory_space<vmem>>, %arg2: memref<64x128xf32, #tpu.memory_space<vmem>>, %arg3: memref<16x128xf32, #tpu.memory_space<vmem>>) attributes {dimension_semantics = [#tpu.dimension_semantics<parallel>], iteration_bounds = array<i64: 1>, scalar_prefetch = 0 : i64, scratch_operands = 0 : i64, tpu.core_type = #tpu.core_type<tc>, window_params = [{transform_indices = @transform_0, window_bounds = array<i64: 16, 1>}, {pipeline_mode = #tpu.pipeline_mode<synchronous>, transform_indices = @transform_1, window_bounds = array<i64: 64, 128>}, {transform_indices = @transform_2, window_bounds = array<i64: 16, 128>}]} {
    %0 = tpu.iota {dimensions = array<i32: 1>} : vector<16x64xi32>
    %c0 = arith.constant 0 : index
    %c0_0 = arith.constant 0 : index
    %1 = vector.load %arg1[%c0, %c0_0] : memref<16x1xi32, #tpu.memory_space<vmem>>, vector<16x1xi32>
    %2 = vector.broadcast %1 : vector<16x1xi32> to vector<16x64xi32>
    %3 = arith.cmpi eq, %2, %0 : vector<16x64xi32>
    %4 = arith.extui %3 : vector<16x64xi1> to vector<16x64xi32>
    %5 = arith.sitofp %4 : vector<16x64xi32> to vector<16x64xf32>
    %c0_1 = arith.constant 0 : index
    %c0_2 = arith.constant 0 : index
    %6 = vector.load %arg2[%c0_1, %c0_2] : memref<64x128xf32, #tpu.memory_space<vmem>>, vector<64x128xf32>
    %cst = arith.constant dense<0.000000e+00> : vector<16x128xf32>
    %7 = tpu.matmul %5, %6, %cst {dimension_numbers = #tpu.dot_dimension_numbers<[1], [0], [0], [1], [0, 0, 1, 1], [], []>} : vector<16x64xf32>, vector<64x128xf32>, vector<16x128xf32> -> vector<16x128xf32>
    %cst_3 = arith.constant 11.3137083 : f32
    %8 = vector.broadcast %cst_3 : f32 to vector<16x128xf32>
    %9 = arith.mulf %7, %8 : vector<16x128xf32>
    %c0_4 = arith.constant 0 : index
    %c0_5 = arith.constant 0 : index
    %10 = vector.load %arg3[%c0_4, %c0_5] : memref<16x128xf32, #tpu.memory_space<vmem>>, vector<16x128xf32>
    tpu.vector_store %arg3[%c0_4, %c0_5], %9 {strides = array<i32>} : memref<16x128xf32, #tpu.memory_space<vmem>>, vector<16x128xf32>,
    return
  }
  func.func @transform_0(%arg0: i32) -> (i32, i32) {
    %c0_i32 = arith.constant 0 : i32
    %c0_i32_0 = arith.constant 0 : i32
    return %arg0, %c0_i32 : i32, i32
  }
  func.func @transform_1(%arg0: i32) -> (i32, i32) {
    %c0_i32 = arith.constant 0 : i32
    %c0_i32_0 = arith.constant 0 : i32
    %c0_i32_1 = arith.constant 0 : i32
    return %c0_i32, %c0_i32_0 : i32, i32
  }
  func.func @transform_2(%arg0: i32) -> (i32, i32) {
    %c0_i32 = arith.constant 0 : i32
    %c0_i32_0 = arith.constant 0 : i32
    return %arg0, %c0_i32 : i32, i32
  }
}

</mosaic_0001>

<bundles_post_ra>
// kernel: tpu_custom_call.1
= control target key start
LH: loop header
LB: loop body
LE: loop exit
PB: predicated region body
PF: predicated region fallthrough
CT: control target
= control target key end

     0   :  { %7 = vsyncpa [#allocation3], 0  ;;  %s276_s0 = inlined_call_operand.vmem [shape: s32[16,1], index: 0, kind: input, shape index: {}]   ;;  %s277_s1 = inlined_call_operand.hbm [shape: f32[64,128], index: 1, kind: input, shape index: {}]   ;;  %s278_s2 = inlined_call_operand.hbm [shape: f32[16,128], index: 2, kind: output, shape index: {}]  }
   0x1   :  { %8 = vsyncpa [#allocation4], 0  ;;  %s237_s9 = smov [#allocation2]  }
   0x2   :  { %s16_s10 = sshll.u32 %s237_s9, 4  ;;  %s17_s10 = int_to_ptr.vmem [resolvable:$true] %s16_s10 }
   0x3   :  { %s201_s11 = scalar_lea.vmem %s17_s10, 1024  ;;  %p206_p1 = scmp.lt.s32.totalorder %s17_s10, %s17_s10 }
   0x4   :  { %p202_p0 = scmp.ne.s32.totalorder %s17_s10, %s201_s11  ;;  %p207_p2 = scmp.lt.s32.totalorder %s201_s11, %s201_s11 }
   0x6   :  { %p208_p3 = por %p207_p2, %p206_p1 }
   0x8   :  { %p209_p4 = pnand %p208_p3, %p202_p0 }
   0xa   :  { %212 = shalt.err (!%p209_p4)
}
   0xb   :  { %s238_s12 = smov 128   ;;  %s239_s13 = smov 8  }
   0xc   :  { %22 = dma.hbm_to_vmem [thread:$0]  %s277_s1, 1024, %s17_s10, [#allocation3], %s238_s12, %s238_s12, %s239_s13  }
   0xd   :  { %233 = dma.done.wait [#allocation3], 1024  }
   0xe   :  { %234 = vsyncadd [#allocation3], 4294966272  ;;  %v240_v0 = vmov 0   ;;  %v28_v1 = vld [vmem:[%s276_s0] sm:$0xff]  ;;  %v49_v2 = vld [vmem:[#allocation2 + $0x38] sm:$0xff]  ;;  %v26_v11 = vlaneseq  ;;  %vm50_vm0 = vcmask 523264  }
   0xf   :  { %192 = vset.pattern.permute.xlu0 %v240_v0  ;;  %167 = vmatprep.subr.mxu0 %v49_v2  ;;  %v48_v3 = vld [vmem:[#allocation2 + $0x30] sm:$0xff]  ;;  %v29_v4 = vld [vmem:[%s276_s0 + $0x8] sm:$0xff]  ;;  %v46_v6 = vld [vmem:[#allocation2 + $0x20] sm:$0xff]  ;;  %v241_v14 = vmov 0.0   ;;  %s242_s0 = smov [#allocation5]  }
  0x10   :  { %31 = vperm.xlu0 %192, %v28_v1   ;;  %168 = vmatpush3.msra.mxu0 %v49_v2  ;;  %v47_v5 = vld [vmem:[#allocation2 + $0x28] sm:$0xff]  ;;  %v45_v7 = vld [vmem:[#allocation2 + $0x18] sm:$0xff]  ;;  %v44_v8 = vld [vmem:[#allocation2 + $0x10] sm:$0xff]  ;;  %v27_v12 = vand.u32 127, %v26_v11  ;;  %s141_s1 = sshll.u32 %s242_s0, 4  ;;  %s142_s1 = int_to_ptr.vmem [resolvable:$true] %s141_s1 }
  0x11   :  { %169 = vmatprep.subr.mxu0 %v48_v3  ;;  %v43_v9 = vld [vmem:[#allocation2 + $0x8] sm:$0xff]  ;;  %v42_v10 = vld [vmem:[#allocation2] sm:$0xff]  ;;  %s213_s20 = scalar_lea.vmem %s142_s1, 256  ;;  %p218_p6 = scmp.lt.s32.totalorder %s142_s1, %s142_s1 }
  0x12   :  { %170 = vmatpush3.msra.mxu0 %v48_v3  ;;  %p214_p5 = scmp.ne.s32.totalorder %s142_s1, %s213_s20  ;;  %p219_p7 = scmp.lt.s32.totalorder %s213_s20, %s213_s20 }
  0x13   :  { %171 = vmatprep.subr.mxu0 %v47_v5 }
  0x14   :  { %34 = vperm.xlu0 %192, %v29_v4   ;;  %172 = vmatpush3.msra.mxu0 %v47_v5  ;;  %p220_p8 = por %p219_p7, %p218_p6 }
  0x15   :  { %173 = vmatprep.subr.mxu0 %v46_v6 }
  0x16   :  { %174 = vmatpush3.msra.mxu0 %v46_v6  ;;  %p221_p9 = pnand %p220_p8, %p214_p5 }
  0x17   :  { %175 = vmatprep.subr.mxu0 %v45_v7 }
  0x18   :  { %176 = vmatpush3.msra.mxu0 %v45_v7 }
  0x19   :  { %177 = vmatprep.subr.mxu0 %v44_v8 }
  0x1a   :  { %178 = vmatpush3.msra.mxu0 %v44_v8 }
  0x1b   :  { %179 = vmatprep.subr.mxu0 %v43_v9 }
  0x1c   :  { %180 = vmatpush3.msra.mxu0 %v43_v9 }
  0x1d   :  { %181 = vmatprep.subr.mxu0 %v42_v10 }
  0x1e   :  { %182 = vmatpush3.msra.mxu0 %v42_v10 }
  0x8b   :  { %v32_v13 = vpop.permute.xlu0 %31 }
  0x8c   :  { %vm36_vm1 = vcmp.eq.s32.totalorder %v32_v13, %v27_v12 }
  0x8d   :  { %v153_v15 = vsel %vm36_vm1, 1.0, %v241_v14 }
  0x8e   :  { %183 = vmatprep.mubr.msk.f32.mxu0 %vm50_vm0, %v153_v15 }
  0x8f   :  { %v35_v16 = vpop.permute.xlu0 %34 }
  0x90   :  { %vm37_vm2 = vcmp.eq.s32.totalorder %v35_v16, %v27_v12 }
  0x91   :  { %v154_v17 = vsel %vm37_vm2, 1.0, %v241_v14 }
  0x92   :  { %184 = vmatmul.mubr.msk.f32.vlgmr.msra.gmra.mxu0 %vm50_vm0, %v154_v17 }
 0x152   :  { %v185_v18 = vpop.f32.mrf.mxu0 }
 0x153   :  { %v133_v19 = vmul.f32 11.313708, %v185_v18 }
 0x154   :  { %v123_v20 = vpop.f32.mrf.mxu0 }
 0x155   :  { %135 = vst [vmem:[#allocation5 + $0x8] sm:$0xff] %v133_v19  ;;  %v132_v21 = vmul.f32 11.313708, %v123_v20 }
 0x157   :  { %134 = vst [vmem:[#allocation5] sm:$0xff] %v132_v21 }
 0x158   :  { %224 = shalt.err (!%p221_p9)
}
 0x159   :  { %147 = dma.vmem_to_hbm [thread:$0]  %s142_s1, 256, %s278_s2, [#allocation4], %s238_s12, %s238_s12, %s239_s13  }
 0x15a   :  { %235 = dma.done.wait [#allocation4], 256  }
 0x15b   :  { %236 = vsyncadd [#allocation4], 4294967040 }
 0x15c   :  { %151 = vsyncpa [#allocation3], 1 }
 0x15d   :  { %152 = vsyncpa [#allocation4], 1 }

</bundles_post_ra>
